<compile_context>
chip_gen: v5e
topology: v5e:2x2
jax: 0.10.0
libtpu: 0.0.40
codegen_flags: <defaults>
</compile_context>

<pallas_src>
import functools

import jax
import jax.numpy as jnp
from jax import lax
from jax.experimental import pallas as pl
from jax.experimental.pallas import tpu as pltpu

_LANES = 128
_STATIC_UNROLL_MAX = 32  # up to 32 groups (tk <= 4096) -> static Python unroll


def _round_up(x, m):
    return ((x + m - 1) // m) * m


def _cdiv(a, b):
    return (a + b - 1) // b


def ntk_forward_kernel(jac_ref, p_ref, o_ref, acc_ref, *, rem):
    # jac_ref: (tm, tk) jac dtype   p_ref: (1, tk) f32   o_ref: (tm, 1) f32
    # acc_ref: (tm, 128) f32 lane-wise partial sums (persists across the k axis)
    # rem    : static number of valid columns in the LAST k tile (0 < rem <= tk)
    k = pl.program_id(1)
    num_k = pl.num_programs(1)
    tk = jac_ref.shape[1]
    full_groups = tk // _LANES

    @pl.when(k == 0)
    def _init():
        acc_ref[...] = jnp.zeros_like(acc_ref)

    def group_at(acc, start):
        # One aligned 128-lane group: pure VALU broadcast-multiply + accumulate.
        a = jac_ref[:, pl.ds(start, _LANES)].astype(jnp.float32)
        pv = p_ref[:, pl.ds(start, _LANES)]          # already f32 (cast hoisted to wrapper)
        return acc + a * pv

    def accumulate(n_full, tail_lanes):
        acc = acc_ref[...]
        if 0 < n_full <= _STATIC_UNROLL_MAX:
            for g in range(n_full):                  # static unroll (LLO visibility)
                acc = group_at(acc, g * _LANES)
        elif n_full > 0:
            def body(g, a):
                return group_at(a, pl.multiple_of(g * _LANES, _LANES))
            acc = lax.fori_loop(0, n_full, body, acc, unroll=8)
        if tail_lanes > 0:
            # Single partial group of the last k tile: mask OOB lanes explicitly
            # (out-of-bounds block lanes contain unspecified data, not zeros).
            start = n_full * _LANES
            a = jac_ref[:, pl.ds(start, _LANES)].astype(jnp.float32)
            lane = lax.broadcasted_iota(jnp.int32, (1, _LANES), 1)
            a = jnp.where(lane < tail_lanes, a, 0.0)
            acc = acc + a * p_ref[:, pl.ds(start, _LANES)]
        acc_ref[...] = acc

    if rem == tk:
        # P divides evenly into k tiles: every tile takes the unmasked fast path.
        accumulate(full_groups, 0)
    else:
        last = num_k - 1

        @pl.when(k < last)
        def _steady():
            accumulate(full_groups, 0)

        @pl.when(k == last)
        def _tail():
            accumulate(rem // _LANES, rem % _LANES)

    @pl.when(k == num_k - 1)
    def _finalize():
        # One cross-lane reduce + narrow store per row tile (negligible).
        o_ref[...] = jnp.sum(acc_ref[...], axis=-1, keepdims=True).astype(o_ref.dtype)


def ntk_forward(jac, flat_params, *, tm=None, tk=None, jac_tile_mib=8):
    """Pallas implementation of NTK.forward: (B, O, P) @ (P,) -> (B, O)."""
    B, O, P = jac.shape
    M = B * O

    jac2d = jac.reshape(M, P)                 # free row-major view, NOT copied/padded
    itemsize = jnp.dtype(jac2d.dtype).itemsize

    # --- tile selection (byte budget, not fixed tk) ---
    sub = 16 if itemsize < 4 else 8           # bf16 packs 2 rows/sublane -> tm % 16
    if tm is None:
        tm = 128
    tm = max(sub, _round_up(min(tm, _round_up(M, sub)), sub))

    p128 = _round_up(P, _LANES)
    if tk is None:
        budget = jac_tile_mib << 20
        tk = max(_LANES, (budget // (tm * itemsize)) // _LANES * _LANES)
    else:
        tk = max(_LANES, _round_up(tk, _LANES))
    tk = min(tk, p128)
    num_k = _cdiv(P, tk)
    tk = _round_up(_cdiv(p128, num_k), _LANES)     # balance tiles (tail not tiny)
    num_k = _cdiv(P, tk)
    rem = P - (num_k - 1) * tk                     # valid columns in last k tile

    m_out = _round_up(M, tm)
    grid = (m_out // tm, num_k)

    # Only the tiny parameter row is padded (to a lane multiple) and pre-cast to f32,
    # so the kernel never casts it per group and masked-tail lanes are exactly 0.
    p_row = jnp.pad(flat_params.astype(jnp.float32).reshape(1, P),
                    ((0, 0), (0, p128 - P)))

    # VMEM budget: double-buffered jac + params tiles, accumulator, output tile.
    vmem_need = (2 * tm * tk * itemsize + 2 * tk * 4 + tm * _LANES * 4 + 2 * tm * 4)
    vmem_limit = min(max(int(vmem_need * 1.3) + (2 << 20), 24 << 20), 56 << 20)

    out = pl.pallas_call(
        functools.partial(ntk_forward_kernel, rem=rem),
        out_shape=jax.ShapeDtypeStruct((m_out, 1), jnp.float32),
        grid_spec=pltpu.PrefetchScalarGridSpec(
            num_scalar_prefetch=0,
            grid=grid,                                          # reduction axis last
            in_specs=[
                pl.BlockSpec((tm, tk), lambda i, k: (i, k)),    # streaming jac tile
                pl.BlockSpec((1, tk), lambda i, k: (0, k)),     # f32 parameter row tile
            ],
            out_specs=pl.BlockSpec((tm, 1), lambda i, k: (i, 0)),
            scratch_shapes=[pltpu.VMEM((tm, _LANES), jnp.float32)],
        ),
        compiler_params=pltpu.CompilerParams(
            # Row axis parallel (v7x megacore shards row tiles), reduction arbitrary.
            dimension_semantics=("parallel", "arbitrary"),
            vmem_limit_bytes=vmem_limit,
        ),
    )(jac2d, p_row)

    return out[:M, 0].reshape(B, O).astype(jac.dtype)


def make_net_params(key, d_in, hidden, d_out):
    """Deterministic params for a 2-layer MLP (the `net` wrapped by NTK).
    PyTorch parameter order: W1 (h, d_in), b1 (h,), W2 (d_out, h), b2 (d_out,)."""
    k1, k2, k3, k4 = jax.random.split(key, 4)
    w1 = jax.random.normal(k1, (hidden, d_in), jnp.float32) * 0.1
    b1 = jax.random.normal(k2, (hidden,), jnp.float32) * 0.1
    w2 = jax.random.normal(k3, (d_out, hidden), jnp.float32) * 0.1
    b2 = jax.random.normal(k4, (d_out,), jnp.float32) * 0.1
    return [w1, b1, w2, b2]


if __name__ == "__main__":
    # Small synthetic config for the wrapped net: Linear(16->32) -> Linear(32->4)
    B, d_in, hidden, d_out = 2, 16, 32, 4

    key = jax.random.PRNGKey(0)
    kp, kj = jax.random.split(key)

    params = make_net_params(kp, d_in, hidden, d_out)
    # flat_params = torch.cat([p.flatten() for p in net.parameters()])
    flat_params = jnp.concatenate([p.reshape(-1) for p in params])
    P = flat_params.shape[0]  # 32*16 + 32 + 4*32 + 4 = 676

    # Synthetic Jacobian input (what self.get_jac would produce): (B, O, P)
    # TODO(synk): get_jac / get_layerwise_jac (vmap(jacrev)) are Jacobian data-prep,
    # not the forward hot path; here jac is supplied directly as the forward input.
    jac = jax.random.normal(kj, (B, d_out, P), jnp.float32)

    ref = jnp.einsum("bop,p->bo", jac, flat_params)

    # Default (budget-sized) tiling: single k tile with a masked 36-lane tail.
    out = jax.block_until_ready(ntk_forward(jac, flat_params))
    assert out.shape == (B, d_out)
    assert jnp.allclose(out, ref, atol=1e-4, rtol=1e-4)

    # Forced small tiles: exercises multi-k accumulation, pl.when steady/tail split.
    out_small = jax.block_until_ready(ntk_forward(jac, flat_params, tm=8, tk=256))
    assert jnp.allclose(out_small, ref, atol=1e-4, rtol=1e-4)

    print("KERNEL_OK")
</pallas_src>

<mosaic_0001>
module attributes {stable_mosaic.version = 11 : i64} {
  func.func @ntk_forward_kernel(%arg0: i32, %arg1: i32, %arg2: memref<8x768xf32, #tpu.memory_space<vmem>>, %arg3: memref<1x768xf32, #tpu.memory_space<vmem>>, %arg4: memref<8x1xf32, #tpu.memory_space<vmem>>, %arg5: memref<8x128xf32, #tpu.memory_space<vmem>>) attributes {dimension_semantics = [#tpu.dimension_semantics<parallel>, #tpu.dimension_semantics<arbitrary>], iteration_bounds = array<i64: 1, 1>, scalar_prefetch = 0 : i64, scratch_operands = 1 : i64, tpu.core_type = #tpu.core_type<tc>, window_params = [{transform_indices = @transform_0, window_bounds = array<i64: 8, 768>}, {transform_indices = @transform_1, window_bounds = array<i64: 1, 768>}, {transform_indices = @transform_2, window_bounds = array<i64: 8, 1>}]} {
    %c0_i32 = arith.constant 0 : i32
    %0 = arith.cmpi eq, %arg1, %c0_i32 : i32
    %1 = arith.extui %0 : i1 to i32
    %c0_i32_0 = arith.constant 0 : i32
    %2 = arith.cmpi ne, %1, %c0_i32_0 : i32
    scf.if %2 {
      %cst = arith.constant 0.000000e+00 : f32
      %12 = vector.broadcast %cst : f32 to vector<8x128xf32>
      %c0 = arith.constant 0 : index
      %c0_7 = arith.constant 0 : index
      %13 = vector.load %arg5[%c0, %c0_7] : memref<8x128xf32, #tpu.memory_space<vmem>>, vector<8x128xf32>
      tpu.vector_store %arg5[%c0, %c0_7], %12 {strides = array<i32>} : memref<8x128xf32, #tpu.memory_space<vmem>>, vector<8x128xf32>,
    } else {
    }
    %c0_i32_1 = arith.constant 0 : i32
    %3 = arith.cmpi slt, %arg1, %c0_i32_1 : i32
    %4 = arith.extui %3 : i1 to i32
    %c0_i32_2 = arith.constant 0 : i32
    %5 = arith.cmpi ne, %4, %c0_i32_2 : i32
    scf.if %5 {
      %c0 = arith.constant 0 : index
      %c0_7 = arith.constant 0 : index
      %12 = vector.load %arg5[%c0, %c0_7] : memref<8x128xf32, #tpu.memory_space<vmem>>, vector<8x128xf32>
      %c0_8 = arith.constant 0 : index
      %c0_9 = arith.constant 0 : index
      %13 = vector.load %arg2[%c0_8, %c0_9] : memref<8x768xf32, #tpu.memory_space<vmem>>, vector<8x128xf32>
      %c0_10 = arith.constant 0 : index
      %c0_11 = arith.constant 0 : index
      %14 = vector.load %arg3[%c0_10, %c0_11] : memref<1x768xf32, #tpu.memory_space<vmem>>, vector<1x128xf32>
      %15 = vector.broadcast %14 : vector<1x128xf32> to vector<8x128xf32>
      %16 = arith.mulf %13, %15 : vector<8x128xf32>
      %17 = arith.addf %12, %16 : vector<8x128xf32>
      %c0_12 = arith.constant 0 : index
      %c128 = arith.constant 128 : index
      %18 = vector.load %arg2[%c0_12, %c128] : memref<8x768xf32, #tpu.memory_space<vmem>>, vector<8x128xf32>
      %c0_13 = arith.constant 0 : index
      %c128_14 = arith.constant 128 : index
      %19 = vector.load %arg3[%c0_13, %c128_14] : memref<1x768xf32, #tpu.memory_space<vmem>>, vector<1x128xf32>
      %20 = vector.broadcast %19 : vector<1x128xf32> to vector<8x128xf32>
      %21 = arith.mulf %18, %20 : vector<8x128xf32>
      %22 = arith.addf %17, %21 : vector<8x128xf32>
      %c0_15 = arith.constant 0 : index
      %c256 = arith.constant 256 : index
      %23 = vector.load %arg2[%c0_15, %c256] : memref<8x768xf32, #tpu.memory_space<vmem>>, vector<8x128xf32>
      %c0_16 = arith.constant 0 : index
      %c256_17 = arith.constant 256 : index
      %24 = vector.load %arg3[%c0_16, %c256_17] : memref<1x768xf32, #tpu.memory_space<vmem>>, vector<1x128xf32>
      %25 = vector.broadcast %24 : vector<1x128xf32> to vector<8x128xf32>
      %26 = arith.mulf %23, %25 : vector<8x128xf32>
      %27 = arith.addf %22, %26 : vector<8x128xf32>
      %c0_18 = arith.constant 0 : index
      %c384 = arith.constant 384 : index
      %28 = vector.load %arg2[%c0_18, %c384] : memref<8x768xf32, #tpu.memory_space<vmem>>, vector<8x128xf32>
      %c0_19 = arith.constant 0 : index
      %c384_20 = arith.constant 384 : index
      %29 = vector.load %arg3[%c0_19, %c384_20] : memref<1x768xf32, #tpu.memory_space<vmem>>, vector<1x128xf32>
      %30 = vector.broadcast %29 : vector<1x128xf32> to vector<8x128xf32>
      %31 = arith.mulf %28, %30 : vector<8x128xf32>
      %32 = arith.addf %27, %31 : vector<8x128xf32>
      %c0_21 = arith.constant 0 : index
      %c512 = arith.constant 512 : index
      %33 = vector.load %arg2[%c0_21, %c512] : memref<8x768xf32, #tpu.memory_space<vmem>>, vector<8x128xf32>
      %c0_22 = arith.constant 0 : index
      %c512_23 = arith.constant 512 : index
      %34 = vector.load %arg3[%c0_22, %c512_23] : memref<1x768xf32, #tpu.memory_space<vmem>>, vector<1x128xf32>
      %35 = vector.broadcast %34 : vector<1x128xf32> to vector<8x128xf32>
      %36 = arith.mulf %33, %35 : vector<8x128xf32>
      %37 = arith.addf %32, %36 : vector<8x128xf32>
      %c0_24 = arith.constant 0 : index
      %c640 = arith.constant 640 : index
      %38 = vector.load %arg2[%c0_24, %c640] : memref<8x768xf32, #tpu.memory_space<vmem>>, vector<8x128xf32>
      %c0_25 = arith.constant 0 : index
      %c640_26 = arith.constant 640 : index
      %39 = vector.load %arg3[%c0_25, %c640_26] : memref<1x768xf32, #tpu.memory_space<vmem>>, vector<1x128xf32>
      %40 = vector.broadcast %39 : vector<1x128xf32> to vector<8x128xf32>
      %41 = arith.mulf %38, %40 : vector<8x128xf32>
      %42 = arith.addf %37, %41 : vector<8x128xf32>
      %c0_27 = arith.constant 0 : index
      %c0_28 = arith.constant 0 : index
      %43 = vector.load %arg5[%c0_27, %c0_28] : memref<8x128xf32, #tpu.memory_space<vmem>>, vector<8x128xf32>
      tpu.vector_store %arg5[%c0_27, %c0_28], %42 {strides = array<i32>} : memref<8x128xf32, #tpu.memory_space<vmem>>, vector<8x128xf32>,
    } else {
    }
    %c0_i32_3 = arith.constant 0 : i32
    %6 = arith.cmpi eq, %arg1, %c0_i32_3 : i32
    %7 = arith.extui %6 : i1 to i32
    %c0_i32_4 = arith.constant 0 : i32
    %8 = arith.cmpi ne, %7, %c0_i32_4 : i32
    scf.if %8 {
      %c0 = arith.constant 0 : index
      %c0_7 = arith.constant 0 : index
      %12 = vector.load %arg5[%c0, %c0_7] : memref<8x128xf32, #tpu.memory_space<vmem>>, vector<8x128xf32>
      %c0_8 = arith.constant 0 : index
      %c0_9 = arith.constant 0 : index
      %13 = vector.load %arg2[%c0_8, %c0_9] : memref<8x768xf32, #tpu.memory_space<vmem>>, vector<8x128xf32>
      %c0_10 = arith.constant 0 : index
      %c0_11 = arith.constant 0 : index
      %14 = vector.load %arg3[%c0_10, %c0_11] : memref<1x768xf32, #tpu.memory_space<vmem>>, vector<1x128xf32>
      %15 = vector.broadcast %14 : vector<1x128xf32> to vector<8x128xf32>
      %16 = arith.mulf %13, %15 : vector<8x128xf32>
      %17 = arith.addf %12, %16 : vector<8x128xf32>
      %c0_12 = arith.constant 0 : index
      %c128 = arith.constant 128 : index
      %18 = vector.load %arg2[%c0_12, %c128] : memref<8x768xf32, #tpu.memory_space<vmem>>, vector<8x128xf32>
      %c0_13 = arith.constant 0 : index
      %c128_14 = arith.constant 128 : index
      %19 = vector.load %arg3[%c0_13, %c128_14] : memref<1x768xf32, #tpu.memory_space<vmem>>, vector<1x128xf32>
      %20 = vector.broadcast %19 : vector<1x128xf32> to vector<8x128xf32>
      %21 = arith.mulf %18, %20 : vector<8x128xf32>
      %22 = arith.addf %17, %21 : vector<8x128xf32>
      %c0_15 = arith.constant 0 : index
      %c256 = arith.constant 256 : index
      %23 = vector.load %arg2[%c0_15, %c256] : memref<8x768xf32, #tpu.memory_space<vmem>>, vector<8x128xf32>
      %c0_16 = arith.constant 0 : index
      %c256_17 = arith.constant 256 : index
      %24 = vector.load %arg3[%c0_16, %c256_17] : memref<1x768xf32, #tpu.memory_space<vmem>>, vector<1x128xf32>
      %25 = vector.broadcast %24 : vector<1x128xf32> to vector<8x128xf32>
      %26 = arith.mulf %23, %25 : vector<8x128xf32>
      %27 = arith.addf %22, %26 : vector<8x128xf32>
      %c0_18 = arith.constant 0 : index
      %c384 = arith.constant 384 : index
      %28 = vector.load %arg2[%c0_18, %c384] : memref<8x768xf32, #tpu.memory_space<vmem>>, vector<8x128xf32>
      %c0_19 = arith.constant 0 : index
      %c384_20 = arith.constant 384 : index
      %29 = vector.load %arg3[%c0_19, %c384_20] : memref<1x768xf32, #tpu.memory_space<vmem>>, vector<1x128xf32>
      %30 = vector.broadcast %29 : vector<1x128xf32> to vector<8x128xf32>
      %31 = arith.mulf %28, %30 : vector<8x128xf32>
      %32 = arith.addf %27, %31 : vector<8x128xf32>
      %c0_21 = arith.constant 0 : index
      %c512 = arith.constant 512 : index
      %33 = vector.load %arg2[%c0_21, %c512] : memref<8x768xf32, #tpu.memory_space<vmem>>, vector<8x128xf32>
      %c0_22 = arith.constant 0 : index
      %c512_23 = arith.constant 512 : index
      %34 = vector.load %arg3[%c0_22, %c512_23] : memref<1x768xf32, #tpu.memory_space<vmem>>, vector<1x128xf32>
      %35 = vector.broadcast %34 : vector<1x128xf32> to vector<8x128xf32>
      %36 = arith.mulf %33, %35 : vector<8x128xf32>
      %37 = arith.addf %32, %36 : vector<8x128xf32>
      %c0_24 = arith.constant 0 : index
      %c640 = arith.constant 640 : index
      %38 = vector.load %arg2[%c0_24, %c640] : memref<8x768xf32, #tpu.memory_space<vmem>>, vector<8x128xf32>
      %39 = tpu.iota {dimensions = array<i32: 1>} : vector<1x128xi32>
      %c36_i32 = arith.constant 36 : i32
      %40 = vector.broadcast %c36_i32 : i32 to vector<1x128xi32>
      %41 = arith.cmpi slt, %39, %40 : vector<1x128xi32>
      %cst = arith.constant 0.000000e+00 : f32
      %42 = vector.shape_cast %41 : vector<1x128xi1> to vector<1x128xi1>
      %43 = vector.broadcast %42 : vector<1x128xi1> to vector<8x128xi1>
      %44 = vector.broadcast %cst : f32 to vector<8x128xf32>
      %45 = arith.select %43, %38, %44 : vector<8x128xi1>, vector<8x128xf32>
      %c0_25 = arith.constant 0 : index
      %c640_26 = arith.constant 640 : index
      %46 = vector.load %arg3[%c0_25, %c640_26] : memref<1x768xf32, #tpu.memory_space<vmem>>, vector<1x128xf32>
      %47 = vector.broadcast %46 : vector<1x128xf32> to vector<8x128xf32>
      %48 = arith.mulf %45, %47 : vector<8x128xf32>
      %49 = arith.addf %37, %48 : vector<8x128xf32>
      %c0_27 = arith.constant 0 : index
      %c0_28 = arith.constant 0 : index
      %50 = vector.load %arg5[%c0_27, %c0_28] : memref<8x128xf32, #tpu.memory_space<vmem>>, vector<8x128xf32>
      tpu.vector_store %arg5[%c0_27, %c0_28], %49 {strides = array<i32>} : memref<8x128xf32, #tpu.memory_space<vmem>>, vector<8x128xf32>,
    } else {
    }
    %c0_i32_5 = arith.constant 0 : i32
    %9 = arith.cmpi eq, %arg1, %c0_i32_5 : i32
    %10 = arith.extui %9 : i1 to i32
    %c0_i32_6 = arith.constant 0 : i32
    %11 = arith.cmpi ne, %10, %c0_i32_6 : i32
    scf.if %11 {
      %c0 = arith.constant 0 : index
      %c0_7 = arith.constant 0 : index
      %12 = vector.load %arg5[%c0, %c0_7] : memref<8x128xf32, #tpu.memory_space<vmem>>, vector<8x128xf32>
      %cst = arith.constant dense<0.000000e+00> : vector<8xf32>
      %13 = vector.multi_reduction <add>, %12, %cst [1] : vector<8x128xf32> to vector<8xf32>
      %14 = vector.shape_cast %13 : vector<8xf32> to vector<8x1xf32>
      %c0_8 = arith.constant 0 : index
      %c0_9 = arith.constant 0 : index
      %15 = vector.load %arg4[%c0_8, %c0_9] : memref<8x1xf32, #tpu.memory_space<vmem>>, vector<8x1xf32>
      tpu.vector_store %arg4[%c0_8, %c0_9], %14 {strides = array<i32>} : memref<8x1xf32, #tpu.memory_space<vmem>>, vector<8x1xf32>,
    } else {
    }
    return
  }
  func.func @transform_0(%arg0: i32, %arg1: i32) -> (i32, i32) {
    %c0_i32 = arith.constant 0 : i32
    return %arg0, %arg1 : i32, i32
  }
  func.func @transform_1(%arg0: i32, %arg1: i32) -> (i32, i32) {
    %c0_i32 = arith.constant 0 : i32
    %c0_i32_0 = arith.constant 0 : i32
    return %c0_i32, %arg1 : i32, i32
  }
  func.func @transform_2(%arg0: i32, %arg1: i32) -> (i32, i32) {
    %c0_i32 = arith.constant 0 : i32
    %c0_i32_0 = arith.constant 0 : i32
    return %arg0, %c0_i32 : i32, i32
  }
}

</mosaic_0001>

<bundles_post_ra>
// kernel: tpu_custom_call.1
= control target key start
LH: loop header
LB: loop body
LE: loop exit
PB: predicated region body
PF: predicated region fallthrough
CT: control target
= control target key end

     0   :  { %7 = vsyncpa [#allocation4], 0  ;;  %s242_s0 = inlined_call_operand.hbm [shape: f32[8,676], index: 0, kind: input, shape index: {}]   ;;  %s243_s1 = inlined_call_operand.hbm [shape: f32[1,768], index: 1, kind: input, shape index: {}]   ;;  %s244_s2 = inlined_call_operand.vmem [shape: f32[8,1], index: 2, kind: output, shape index: {}]  }
   0x1   :  { %s14_s11 = sshll.u32 %s242_s0, 4  ;;  %s15_s11 = int_to_ptr.hbm [resolvable:$true] %s14_s11 }
   0x2   :  { %8 = vsyncpa [#allocation6], 0  ;;  %s216_s12 = smov [#allocation3]   ;;  %s25_s16 = sshll.u32 %s243_s1, 4  ;;  %s26_s16 = int_to_ptr.hbm [resolvable:$true] %s25_s16 }
   0x3   :  { %s16_s13 = sshll.u32 %s216_s12, 4  ;;  %s217_s17 = smov [#allocation5]   ;;  %s17_s13 = int_to_ptr.vmem [resolvable:$true] %s16_s13 }
   0x4   :  { %19 = dma.hbm_to_vmem [thread:$0]  %s15_s11, 768, %s17_s13, [#allocation4]  }
   0x5   :  { %s27_s18 = sshll.u32 %s217_s17, 4  ;;  %s28_s18 = int_to_ptr.vmem [resolvable:$true] %s27_s18 }
   0x6   :  { %30 = dma.hbm_to_vmem [thread:$0]  %s26_s16, 96, %s28_s18, [#allocation6]  }
   0x7   :  { %212 = dma.done.wait [#allocation4], 768  }
   0x8   :  { %213 = vsyncadd [#allocation4], 4294966528 }
   0x9   :  { %214 = dma.done.wait [#allocation6], 96  }
   0xa   :  { %215 = vsyncadd [#allocation6], 4294967200  ;;  %v132_v0 = vlaneseq  ;;  %v96_v2 = vld [vmem:[#allocation3] sm:$0xff]  ;;  %v158_v3 = vld [vmem:[#allocation5] ss:$0 sm:$0xff]  ;;  %vm148_vm1 = vcmask 7168  }
   0xb   :  { %v103_v4 = vld [vmem:[#allocation3 + $0x8] sm:$0xff]  ;;  %v159_v5 = vld [vmem:[#allocation5 + $0x1] ss:$0 sm:$0xff]  ;;  %v101_v6 = vmul.f32 %v158_v3, %v96_v2  ;;  %v160_v8 = vld [vmem:[#allocation5 + $0x2] ss:$0 sm:$0xff] }
   0xc   :  { %v133_v1 = vand.u32 127, %v132_v0  ;;  %v110_v7 = vld [vmem:[#allocation3 + $0x10] sm:$0xff]  ;;  %v108_v9 = vmul.f32 %v159_v5, %v103_v4  ;;  %v117_v10 = vld [vmem:[#allocation3 + $0x18] sm:$0xff]  ;;  %v124_v13 = vld [vmem:[#allocation3 + $0x20] sm:$0xff] }
   0xd   :  { %v161_v11 = vld [vmem:[#allocation5 + $0x3] ss:$0 sm:$0xff]  ;;  %v115_v12 = vmul.f32 %v160_v8, %v110_v7  ;;  %v162_v14 = vld [vmem:[#allocation5 + $0x4] ss:$0 sm:$0xff]  ;;  %v131_v17 = vld [vmem:[#allocation3 + $0x28] sm:$0xff] }
   0xe   :  { %vm134_vm0 = vcmp.lt.s32.totalorder %v133_v1, 36  ;;  %v109_v15 = vadd.f32 %v108_v9, %v101_v6  ;;  %v122_v16 = vmul.f32 %v161_v11, %v117_v10  ;;  %v163_v18 = vld [vmem:[#allocation5 + $0x5] ss:$0 sm:$0xff]  ;;  %v129_v21 = vmul.f32 %v162_v14, %v124_v13 }
   0xf   :  { %v137_v19 = vsel %vm134_vm0, %v131_v17, 0.0 }
  0x10   :  { %v116_v20 = vadd.f32 %v115_v12, %v109_v15  ;;  %v142_v23 = vmul.f32 %v163_v18, %v137_v19 }
  0x12   :  { %v123_v22 = vadd.f32 %v122_v16, %v116_v20 }
  0x14   :  { %v130_v24 = vadd.f32 %v129_v21, %v123_v22 }
  0x16   :  { %v143_v25 = vadd.f32 %v142_v23, %v130_v24 }
  0x18   :  { %146 = vadd.xlane.f32.xlu0 %v143_v25 }
  0x8b   :  { %v147_v26 = vpop.xlane.xlu0 %146 }
  0x8c   :  { %149 = vst.msk [vmem:[%s244_s2] sm:$0xff] %vm148_vm1, %v147_v26 }
  0x8d   :  { %154 = vsyncpa [#allocation4], 1 }
  0x8e   :  { %155 = vsyncpa [#allocation6], 1 }

</bundles_post_ra>
